<compile_context>
chip_gen: v5e
topology: v5e:2x2
jax: 0.10.0
libtpu: 0.0.40
codegen_flags: <defaults>
</compile_context>

<pallas_src>
import functools

import jax
import jax.numpy as jnp
from jax.experimental import pallas as pl
from jax.experimental.pallas import tpu as pltpu

LAYER_NUM = 2          # Cross(layer_num=2)
# TODO(synk): MLP class is not given in the reference; assumed the standard
# definition: hidden_layers x (Linear + ReLU) followed by a Linear output.
HIDDEN_LAYERS = 3


def dcn_kernel(x_ref, cw_ref, w1t_ref, w2t_ref, w3t_ref, w4t_ref, vec_ref,
               out_ref):
    """One batch tile; batch is on the 128-lane axis.

    x_ref   : [F, TB]            bf16  input tile (batch-transposed)
    cw_ref  : [L*F, F]           bf16  cross weights, layer i = rows [i*F,(i+1)*F)
    w1t_ref : [H, F]             bf16  deep layer-1 weight (pre-transposed)
    w2t_ref : [H, H]             bf16
    w3t_ref : [H, H]             bf16
    w4t_ref : [E, H]             bf16
    vec_ref : [L*F+3H+E+F+E, 1]  f32   packed cross/MLP biases + together weights
    out_ref : [1, TB]            f32   sigmoid(logit), lane-dense
    """
    x0_bf = x_ref[...]                                   # [F, TB] bf16
    x0 = x0_bf.astype(jnp.float32)                       # elementwise math in f32
    F = x0.shape[0]
    H = w2t_ref.shape[0]
    E = w4t_ref.shape[0]
    bf16 = jnp.bfloat16

    # Static, 8-aligned offsets into the packed column-vector operand.
    o_b1 = LAYER_NUM * F
    o_b2 = o_b1 + H
    o_b3 = o_b2 + H
    o_b4 = o_b3 + H
    o_twc = o_b4 + E
    o_twd = o_twc + F

    # --------------- Cross network:  x_l = x_0 * (W_i x_l + b_i) + x_l -------
    xl = x0
    xl_bf = x0_bf
    for i in range(LAYER_NUM):
        w_i = cw_ref[i * F:(i + 1) * F, :]                            # [F, F]
        xl_w = jnp.dot(w_i, xl_bf, preferred_element_type=jnp.float32)  # [F, TB]
        cb_i = vec_ref[i * F:(i + 1) * F, :]                          # [F, 1]
        xl = x0 * (xl_w + cb_i) + xl
        xl_bf = xl.astype(bf16)
    cross_out = xl                                                    # [F, TB]

    # --------------- Deep MLP (batch on lanes) --------------------------------
    h = jnp.dot(w1t_ref[...], x0_bf, preferred_element_type=jnp.float32)
    h = jnp.maximum(h + vec_ref[o_b1:o_b1 + H, :], 0.0)               # [H, TB]
    h = jnp.dot(w2t_ref[...], h.astype(bf16), preferred_element_type=jnp.float32)
    h = jnp.maximum(h + vec_ref[o_b2:o_b2 + H, :], 0.0)
    h = jnp.dot(w3t_ref[...], h.astype(bf16), preferred_element_type=jnp.float32)
    h = jnp.maximum(h + vec_ref[o_b3:o_b3 + H, :], 0.0)
    deep_out = (jnp.dot(w4t_ref[...], h.astype(bf16),
                        preferred_element_type=jnp.float32)
                + vec_ref[o_b4:o_b4 + E, :])                          # [E, TB]

    # --------------- together Linear (bias=False) + sigmoid -------------------
    # N=1 matmul replaced by VPU multiply + sublane (XLU) reduction; output is a
    # lane-dense [1, TB] row.
    twc = vec_ref[o_twc:o_twc + F, :]                                 # [F, 1]
    twd = vec_ref[o_twd:o_twd + E, :]                                 # [E, 1]
    logit = (jnp.sum(cross_out * twc, axis=0, keepdims=True)
             + jnp.sum(deep_out * twd, axis=0, keepdims=True))        # [1, TB]
    out_ref[...] = jax.nn.sigmoid(logit)


def dcnv2s_forward(user_ids, item_ids, sparse_features, params, *, tb=1024):
    """Glue (gathers / concat / weight prep) in JAX, dense math fused in Pallas."""
    u = params["user_emb"][user_ids]
    it = params["item_emb"][item_ids]
    if user_ids.ndim > 1:                       # multi-hot id lists -> sum, as in the module
        u = u.sum(axis=-2)
        it = it.sum(axis=-2)
    sp = [params["sparse_embs"][i][sparse_features[:, i]]
          for i in range(sparse_features.shape[-1])]
    x = jnp.concatenate([u, it] + sp, axis=-1)                    # [B, F] f32

    B, F = x.shape
    H = params["w2"].shape[0]
    E = params["w4"].shape[1]
    L = LAYER_NUM
    bf16 = jnp.bfloat16

    x_t = x.T.astype(bf16)                                        # [F, B], batch -> lanes

    # Batch tile: as large as possible (amortizes the ~0.35us per-grid-step
    # overhead and feeds the MXU a large N), always a multiple of 128 lanes.
    # For v7x keep tb <= B/2 so the "parallel" axis can split over both TCs.
    TB = min(tb, pl.cdiv(B, 128) * 128)
    TB = max(128, (TB // 128) * 128)
    n_tiles = pl.cdiv(B, TB)
    B_pad = n_tiles * TB
    if B_pad != B:
        x_t = jnp.pad(x_t, ((0, 0), (0, B_pad - B)))

    # ---- weight prep: pre-transposed, MXU operands in bf16 ------------------
    cw_flat = params["cross_w"].reshape(L * F, F).astype(bf16)    # [L*F, F]
    w1t = params["w1"].T.astype(bf16)                             # [H, F]
    w2t = params["w2"].T.astype(bf16)                             # [H, H]
    w3t = params["w3"].T.astype(bf16)                             # [H, H]
    w4t = params["w4"].T.astype(bf16)                             # [E, H]

    tw = params["together_w"]                                     # [F+E, 1]
    vecs = jnp.concatenate([
        params["cross_b"].reshape(L * F),
        params["b1"].reshape(H), params["b2"].reshape(H),
        params["b3"].reshape(H), params["b4"].reshape(E),
        tw[:F, 0], tw[F:, 0],
    ]).astype(jnp.float32)[:, None]                               # [L*F+3H+E+F+E, 1]

    def resident(arr):              # weights/biases: constant block, stays in VMEM
        nd = arr.ndim
        return pl.BlockSpec(arr.shape, lambda i, _nd=nd: (0,) * _nd)

    inputs = (x_t, cw_flat, w1t, w2t, w3t, w4t, vecs)
    in_specs = ([pl.BlockSpec((F, TB), lambda i: (0, i))]
                + [resident(a) for a in inputs[1:]])

    out = pl.pallas_call(
        dcn_kernel,
        grid=(n_tiles,),
        in_specs=in_specs,
        out_specs=pl.BlockSpec((1, TB), lambda i: (0, i)),
        out_shape=jax.ShapeDtypeStruct((1, B_pad), jnp.float32),
        compiler_params=pltpu.CompilerParams(
            dimension_semantics=("parallel",)),
    )(*inputs)
    return out[0, :B][:, None]                                    # [B, 1]


def reference_forward(user_ids, item_ids, sparse_features, params):
    """Pure-JAX f32 reference mirroring the PyTorch module semantics."""
    u = params["user_emb"][user_ids]
    it = params["item_emb"][item_ids]
    if user_ids.ndim > 1:
        u = u.sum(axis=-2)
        it = it.sum(axis=-2)
    sp = [params["sparse_embs"][i][sparse_features[:, i]]
          for i in range(sparse_features.shape[-1])]
    x0 = jnp.concatenate([u, it] + sp, axis=-1)                   # [B, F]

    # Cross (column-vector formulation, like the PyTorch module)
    xl = x0[:, :, None]                                           # [B, F, 1]
    x0c = xl
    for i in range(LAYER_NUM):
        xl_w = jnp.einsum("fg,bgo->bfo", params["cross_w"][i], xl)
        dot_ = xl_w + params["cross_b"][i]                        # bias is [F, 1]
        xl = x0c * dot_ + xl
    cross_out = xl[:, :, 0]

    h = jax.nn.relu(x0 @ params["w1"] + params["b1"])
    h = jax.nn.relu(h @ params["w2"] + params["b2"])
    h = jax.nn.relu(h @ params["w3"] + params["b3"])
    deep_out = h @ params["w4"] + params["b4"]

    stack = jnp.concatenate([cross_out, deep_out], axis=-1)
    return jax.nn.sigmoid(stack @ params["together_w"])


def init_params(key, user_vocab, item_vocab, vocab_sizes, emb_dim):
    S = len(vocab_sizes)
    F = (S + 2) * emb_dim
    H = 2 * emb_dim
    E = emb_dim
    ks = list(jax.random.split(key, 2 + S + 6))
    p = {}
    p["user_emb"] = jax.random.normal(ks[0], (user_vocab, E), jnp.float32)
    p["item_emb"] = jax.random.normal(ks[1], (item_vocab, E), jnp.float32)
    p["sparse_embs"] = [jax.random.normal(ks[2 + i], (v, E), jnp.float32)
                        for i, v in enumerate(vocab_sizes)]
    k = 2 + S
    xavier_std = (2.0 / (F + F)) ** 0.5
    p["cross_w"] = jax.random.normal(ks[k], (LAYER_NUM, F, F), jnp.float32) * xavier_std
    p["cross_b"] = jnp.zeros((LAYER_NUM, F, 1), jnp.float32)      # nn.init.zeros_
    p["w1"] = jax.random.normal(ks[k + 1], (F, H), jnp.float32) * (2.0 / F) ** 0.5
    p["b1"] = jnp.zeros((H,), jnp.float32)
    p["w2"] = jax.random.normal(ks[k + 2], (H, H), jnp.float32) * (2.0 / H) ** 0.5
    p["b2"] = jnp.zeros((H,), jnp.float32)
    p["w3"] = jax.random.normal(ks[k + 3], (H, H), jnp.float32) * (2.0 / H) ** 0.5
    p["b3"] = jnp.zeros((H,), jnp.float32)
    p["w4"] = jax.random.normal(ks[k + 4], (H, E), jnp.float32) * (2.0 / H) ** 0.5
    p["b4"] = jnp.zeros((E,), jnp.float32)
    p["together_w"] = jax.random.normal(ks[k + 5], (F + E, 1), jnp.float32) * (1.0 / (F + E)) ** 0.5
    return p


if __name__ == "__main__":
    key = jax.random.PRNGKey(0)
    user_vocab, item_vocab = 50, 40
    vocab_sizes = [11, 13, 17, 19]            # 4 sparse features -> F = 48
    emb_dim = 8
    batch = 512                               # 2 grid tiles of TB=256 below

    pkey, dkey = jax.random.split(key)
    params = init_params(pkey, user_vocab, item_vocab, vocab_sizes, emb_dim)

    k1, k2, k3 = jax.random.split(dkey, 3)
    user_ids = jax.random.randint(k1, (batch,), 0, user_vocab)
    item_ids = jax.random.randint(k2, (batch,), 0, item_vocab)
    sparse_features = jnp.stack(
        [jax.random.randint(jax.random.fold_in(k3, i), (batch,), 0, v)
         for i, v in enumerate(vocab_sizes)], axis=-1)            # [B, S]

    # tb=256 at this small batch so the 1-D grid / pipeline has >1 step;
    # production default is tb=1024.
    fwd = jax.jit(functools.partial(dcnv2s_forward, tb=256))
    out = jax.block_until_ready(fwd(user_ids, item_ids, sparse_features, params))

    ref = reference_forward(user_ids, item_ids, sparse_features, params)
    assert out.shape == (batch, 1), out.shape
    # bf16 MXU operands (f32 accumulation) vs. a pure-f32 reference.
    err = float(jnp.max(jnp.abs(out - ref)))
    assert err < 3e-2, err
    print("KERNEL_OK")
</pallas_src>

<mosaic_0001>
module attributes {stable_mosaic.version = 11 : i64} {
  func.func @dcn_kernel(%arg0: i32, %arg1: memref<48x256xbf16, #tpu.memory_space<vmem>>, %arg2: memref<96x48xbf16, #tpu.memory_space<vmem>>, %arg3: memref<16x48xbf16, #tpu.memory_space<vmem>>, %arg4: memref<16x16xbf16, #tpu.memory_space<vmem>>, %arg5: memref<16x16xbf16, #tpu.memory_space<vmem>>, %arg6: memref<8x16xbf16, #tpu.memory_space<vmem>>, %arg7: memref<208x1xf32, #tpu.memory_space<vmem>>, %arg8: memref<1x256xf32, #tpu.memory_space<vmem>>) attributes {dimension_semantics = [#tpu.dimension_semantics<parallel>], iteration_bounds = array<i64: 2>, scalar_prefetch = 0 : i64, scratch_operands = 0 : i64, tpu.core_type = #tpu.core_type<tc>, window_params = [{transform_indices = @transform_0, window_bounds = array<i64: 48, 256>}, {pipeline_mode = #tpu.pipeline_mode<synchronous>, transform_indices = @transform_1, window_bounds = array<i64: 96, 48>}, {pipeline_mode = #tpu.pipeline_mode<synchronous>, transform_indices = @transform_2, window_bounds = array<i64: 16, 48>}, {pipeline_mode = #tpu.pipeline_mode<synchronous>, transform_indices = @transform_3, window_bounds = array<i64: 16, 16>}, {pipeline_mode = #tpu.pipeline_mode<synchronous>, transform_indices = @transform_4, window_bounds = array<i64: 16, 16>}, {pipeline_mode = #tpu.pipeline_mode<synchronous>, transform_indices = @transform_5, window_bounds = array<i64: 8, 16>}, {pipeline_mode = #tpu.pipeline_mode<synchronous>, transform_indices = @transform_6, window_bounds = array<i64: 208, 1>}, {transform_indices = @transform_7, window_bounds = array<i64: 1, 256>}]} {
    %c0 = arith.constant 0 : index
    %c0_0 = arith.constant 0 : index
    %0 = vector.load %arg1[%c0, %c0_0] : memref<48x256xbf16, #tpu.memory_space<vmem>>, vector<48x256xbf16>
    %1 = arith.extf %0 : vector<48x256xbf16> to vector<48x256xf32>
    %c0_1 = arith.constant 0 : index
    %c0_2 = arith.constant 0 : index
    %2 = vector.load %arg2[%c0_1, %c0_2] : memref<96x48xbf16, #tpu.memory_space<vmem>>, vector<48x48xbf16>
    %cst = arith.constant dense<0.000000e+00> : vector<48x256xf32>
    %3 = tpu.matmul %2, %0, %cst {dimension_numbers = #tpu.dot_dimension_numbers<[1], [0], [0], [1], [0, 0, 1, 1], [], []>} : vector<48x48xbf16>, vector<48x256xbf16>, vector<48x256xf32> -> vector<48x256xf32>
    %c0_3 = arith.constant 0 : index
    %c0_4 = arith.constant 0 : index
    %4 = vector.load %arg7[%c0_3, %c0_4] : memref<208x1xf32, #tpu.memory_space<vmem>>, vector<48x1xf32>
    %5 = vector.broadcast %4 : vector<48x1xf32> to vector<48x256xf32>
    %6 = arith.addf %3, %5 : vector<48x256xf32>
    %7 = arith.mulf %1, %6 : vector<48x256xf32>
    %8 = arith.addf %7, %1 : vector<48x256xf32>
    %9 = arith.truncf %8 : vector<48x256xf32> to vector<48x256xbf16>
    %c48 = arith.constant 48 : index
    %c0_5 = arith.constant 0 : index
    %10 = vector.load %arg2[%c48, %c0_5] : memref<96x48xbf16, #tpu.memory_space<vmem>>, vector<48x48xbf16>
    %cst_6 = arith.constant dense<0.000000e+00> : vector<48x256xf32>
    %11 = tpu.matmul %10, %9, %cst_6 {dimension_numbers = #tpu.dot_dimension_numbers<[1], [0], [0], [1], [0, 0, 1, 1], [], []>} : vector<48x48xbf16>, vector<48x256xbf16>, vector<48x256xf32> -> vector<48x256xf32>
    %c48_7 = arith.constant 48 : index
    %c0_8 = arith.constant 0 : index
    %12 = vector.load %arg7[%c48_7, %c0_8] : memref<208x1xf32, #tpu.memory_space<vmem>>, vector<48x1xf32>
    %13 = vector.broadcast %12 : vector<48x1xf32> to vector<48x256xf32>
    %14 = arith.addf %11, %13 : vector<48x256xf32>
    %15 = arith.mulf %1, %14 : vector<48x256xf32>
    %16 = arith.addf %15, %8 : vector<48x256xf32>
    %c0_9 = arith.constant 0 : index
    %c0_10 = arith.constant 0 : index
    %17 = vector.load %arg3[%c0_9, %c0_10] : memref<16x48xbf16, #tpu.memory_space<vmem>>, vector<16x48xbf16>
    %cst_11 = arith.constant dense<0.000000e+00> : vector<16x256xf32>
    %18 = tpu.matmul %17, %0, %cst_11 {dimension_numbers = #tpu.dot_dimension_numbers<[1], [0], [0], [1], [0, 0, 1, 1], [], []>} : vector<16x48xbf16>, vector<48x256xbf16>, vector<16x256xf32> -> vector<16x256xf32>
    %c96 = arith.constant 96 : index
    %c0_12 = arith.constant 0 : index
    %19 = vector.load %arg7[%c96, %c0_12] : memref<208x1xf32, #tpu.memory_space<vmem>>, vector<16x1xf32>
    %20 = vector.broadcast %19 : vector<16x1xf32> to vector<16x256xf32>
    %21 = arith.addf %18, %20 : vector<16x256xf32>
    %cst_13 = arith.constant 0.000000e+00 : f32
    %22 = vector.broadcast %cst_13 : f32 to vector<16x256xf32>
    %23 = arith.maximumf %21, %22 : vector<16x256xf32>
    %c0_14 = arith.constant 0 : index
    %c0_15 = arith.constant 0 : index
    %24 = vector.load %arg4[%c0_14, %c0_15] : memref<16x16xbf16, #tpu.memory_space<vmem>>, vector<16x16xbf16>
    %25 = arith.truncf %23 : vector<16x256xf32> to vector<16x256xbf16>
    %cst_16 = arith.constant dense<0.000000e+00> : vector<16x256xf32>
    %26 = tpu.matmul %24, %25, %cst_16 {dimension_numbers = #tpu.dot_dimension_numbers<[1], [0], [0], [1], [0, 0, 1, 1], [], []>} : vector<16x16xbf16>, vector<16x256xbf16>, vector<16x256xf32> -> vector<16x256xf32>
    %c112 = arith.constant 112 : index
    %c0_17 = arith.constant 0 : index
    %27 = vector.load %arg7[%c112, %c0_17] : memref<208x1xf32, #tpu.memory_space<vmem>>, vector<16x1xf32>
    %28 = vector.broadcast %27 : vector<16x1xf32> to vector<16x256xf32>
    %29 = arith.addf %26, %28 : vector<16x256xf32>
    %cst_18 = arith.constant 0.000000e+00 : f32
    %30 = vector.broadcast %cst_18 : f32 to vector<16x256xf32>
    %31 = arith.maximumf %29, %30 : vector<16x256xf32>
    %c0_19 = arith.constant 0 : index
    %c0_20 = arith.constant 0 : index
    %32 = vector.load %arg5[%c0_19, %c0_20] : memref<16x16xbf16, #tpu.memory_space<vmem>>, vector<16x16xbf16>
    %33 = arith.truncf %31 : vector<16x256xf32> to vector<16x256xbf16>
    %cst_21 = arith.constant dense<0.000000e+00> : vector<16x256xf32>
    %34 = tpu.matmul %32, %33, %cst_21 {dimension_numbers = #tpu.dot_dimension_numbers<[1], [0], [0], [1], [0, 0, 1, 1], [], []>} : vector<16x16xbf16>, vector<16x256xbf16>, vector<16x256xf32> -> vector<16x256xf32>
    %c128 = arith.constant 128 : index
    %c0_22 = arith.constant 0 : index
    %35 = vector.load %arg7[%c128, %c0_22] : memref<208x1xf32, #tpu.memory_space<vmem>>, vector<16x1xf32>
    %36 = vector.broadcast %35 : vector<16x1xf32> to vector<16x256xf32>
    %37 = arith.addf %34, %36 : vector<16x256xf32>
    %cst_23 = arith.constant 0.000000e+00 : f32
    %38 = vector.broadcast %cst_23 : f32 to vector<16x256xf32>
    %39 = arith.maximumf %37, %38 : vector<16x256xf32>
    %c0_24 = arith.constant 0 : index
    %c0_25 = arith.constant 0 : index
    %40 = vector.load %arg6[%c0_24, %c0_25] : memref<8x16xbf16, #tpu.memory_space<vmem>>, vector<8x16xbf16>
    %41 = arith.truncf %39 : vector<16x256xf32> to vector<16x256xbf16>
    %cst_26 = arith.constant dense<0.000000e+00> : vector<8x256xf32>
    %42 = tpu.matmul %40, %41, %cst_26 {dimension_numbers = #tpu.dot_dimension_numbers<[1], [0], [0], [1], [0, 0, 1, 1], [], []>} : vector<8x16xbf16>, vector<16x256xbf16>, vector<8x256xf32> -> vector<8x256xf32>
    %c144 = arith.constant 144 : index
    %c0_27 = arith.constant 0 : index
    %43 = vector.load %arg7[%c144, %c0_27] : memref<208x1xf32, #tpu.memory_space<vmem>>, vector<8x1xf32>
    %44 = vector.broadcast %43 : vector<8x1xf32> to vector<8x256xf32>
    %45 = arith.addf %42, %44 : vector<8x256xf32>
    %c152 = arith.constant 152 : index
    %c0_28 = arith.constant 0 : index
    %46 = vector.load %arg7[%c152, %c0_28] : memref<208x1xf32, #tpu.memory_space<vmem>>, vector<48x1xf32>
    %c200 = arith.constant 200 : index
    %c0_29 = arith.constant 0 : index
    %47 = vector.load %arg7[%c200, %c0_29] : memref<208x1xf32, #tpu.memory_space<vmem>>, vector<8x1xf32>
    %48 = vector.broadcast %46 : vector<48x1xf32> to vector<48x256xf32>
    %49 = arith.mulf %16, %48 : vector<48x256xf32>
    %cst_30 = arith.constant dense<0.000000e+00> : vector<256xf32>
    %50 = vector.multi_reduction <add>, %49, %cst_30 [0] : vector<48x256xf32> to vector<256xf32>
    %51 = vector.shape_cast %50 : vector<256xf32> to vector<1x256xf32>
    %52 = vector.broadcast %47 : vector<8x1xf32> to vector<8x256xf32>
    %53 = arith.mulf %45, %52 : vector<8x256xf32>
    %cst_31 = arith.constant dense<0.000000e+00> : vector<256xf32>
    %54 = vector.multi_reduction <add>, %53, %cst_31 [0] : vector<8x256xf32> to vector<256xf32>
    %55 = vector.shape_cast %54 : vector<256xf32> to vector<1x256xf32>
    %56 = arith.addf %51, %55 : vector<1x256xf32>
    %57 = arith.negf %56 : vector<1x256xf32>
    %58 = math.exp %57 : vector<1x256xf32>
    %cst_32 = arith.constant 1.000000e+00 : f32
    %59 = vector.broadcast %cst_32 : f32 to vector<1x256xf32>
    %60 = arith.addf %59, %58 : vector<1x256xf32>
    %61 = arith.divf %59, %60 : vector<1x256xf32>
    %c0_33 = arith.constant 0 : index
    %c0_34 = arith.constant 0 : index
    %62 = vector.load %arg8[%c0_33, %c0_34] : memref<1x256xf32, #tpu.memory_space<vmem>>, vector<1x256xf32>
    tpu.vector_store %arg8[%c0_33, %c0_34], %61 {strides = array<i32>} : memref<1x256xf32, #tpu.memory_space<vmem>>, vector<1x256xf32>,
    return
  }
  func.func @transform_0(%arg0: i32) -> (i32, i32) {
    %c0_i32 = arith.constant 0 : i32
    %c0_i32_0 = arith.constant 0 : i32
    return %c0_i32, %arg0 : i32, i32
  }
  func.func @transform_1(%arg0: i32) -> (i32, i32) {
    %c0_i32 = arith.constant 0 : i32
    %c0_i32_0 = arith.constant 0 : i32
    %c0_i32_1 = arith.constant 0 : i32
    return %c0_i32, %c0_i32_0 : i32, i32
  }
  func.func @transform_2(%arg0: i32) -> (i32, i32) {
    %c0_i32 = arith.constant 0 : i32
    %c0_i32_0 = arith.constant 0 : i32
    %c0_i32_1 = arith.constant 0 : i32
    return %c0_i32, %c0_i32_0 : i32, i32
  }
  func.func @transform_3(%arg0: i32) -> (i32, i32) {
    %c0_i32 = arith.constant 0 : i32
    %c0_i32_0 = arith.constant 0 : i32
    %c0_i32_1 = arith.constant 0 : i32
    return %c0_i32, %c0_i32_0 : i32, i32
  }
  func.func @transform_4(%arg0: i32) -> (i32, i32) {
    %c0_i32 = arith.constant 0 : i32
    %c0_i32_0 = arith.constant 0 : i32
    %c0_i32_1 = arith.constant 0 : i32
    return %c0_i32, %c0_i32_0 : i32, i32
  }
  func.func @transform_5(%arg0: i32) -> (i32, i32) {
    %c0_i32 = arith.constant 0 : i32
    %c0_i32_0 = arith.constant 0 : i32
    %c0_i32_1 = arith.constant 0 : i32
    return %c0_i32, %c0_i32_0 : i32, i32
  }
  func.func @transform_6(%arg0: i32) -> (i32, i32) {
    %c0_i32 = arith.constant 0 : i32
    %c0_i32_0 = arith.constant 0 : i32
    %c0_i32_1 = arith.constant 0 : i32
    return %c0_i32, %c0_i32_0 : i32, i32
  }
  func.func @transform_7(%arg0: i32) -> (i32, i32) {
    %c0_i32 = arith.constant 0 : i32
    %c0_i32_0 = arith.constant 0 : i32
    return %c0_i32, %arg0 : i32, i32
  }
}

</mosaic_0001>

<bundles_post_ra>
// kernel: dcnv2s_forward.1
= control target key start
LH: loop header
LB: loop body
LE: loop exit
PB: predicated region body
PF: predicated region fallthrough
CT: control target
= control target key end

     0   :  { %12 = vsyncpa [#allocation4], 0  ;;  %s1718_s0 = inlined_call_operand.vmem [shape: bf16[48,512], index: 0, kind: input, shape index: {}]   ;;  %s1719_s1 = inlined_call_operand.vmem [shape: bf16[96,48], index: 1, kind: input, shape index: {}]   ;;  %s1720_s2 = inlined_call_operand.vmem [shape: bf16[16,48], index: 2, kind: input, shape index: {}]   ;;  %s1721_s3 = inlined_call_operand.vmem [shape: bf16[16,16], index: 3, kind: input, shape index: {}]   ;;  %s1722_s4 = inlined_call_operand.vmem [shape: bf16[16,16], index: 4, kind: input, shape index: {}]   ;;  %s1723_s5 = inlined_call_operand.vmem [shape: bf16[8,16], index: 5, kind: input, shape index: {}]   ;;  %s1724_s6 = inlined_call_operand.vmem [shape: f32[208,1], index: 6, kind: input, shape index: {}]   ;;  %s1725_s7 = inlined_call_operand.hbm [shape: f32[1,512], index: 7, kind: output, shape index: {}]  }
   0x1   :  { %14 = vsyncpa [#allocation4 + $0x1], 0  ;;  %s1361_s24 = smov 0   ;;  %s1363_s25 = smov 0  }
   0x2   :  { %s1365_s26 = smov 0   ;;  %s1367_s27 = smov 0  }
   0x3 LB: > { %s1093_s28 = sadd.s32 4294967295, %s1318_s27   ;;  %s1094_s29 = sadd.s32 4294967294, %s1318_s27   ;;  %s1318_s27 = sphi %s1367_s27, %s1733_s27   ;;  %s1314_s26 = sphi %s1365_s26, %s1732_s26   ;;  %s1310_s25 = sphi %s1363_s25, %s1731_s25   ;;  %s1306_s24 = sphi %s1361_s24, %s1730_s24  }
   0x4   : > { %s1384_s30 = sadd.s32 1, %s1318_s27   ;;  %s27_s8 = sadd.s32 1, %s1314_s26 }
   0x5   : > { %s24_s9 = ssub.s32 %s1318_s27, %s1384_s30  ;;  %p34_p0 = scmp.ne.s32.totalorder %s1314_s26, %s1310_s25 }
   0x6   : > { %p25_p1 = scmp.eq.s32.totalorder %s24_s9, 0  ;;  %p35_p2 = scmp.eq.s32.totalorder %s1318_s27, 0 }
   0x7   : > { %p190_p3 = scmp.eq.s32.totalorder %s1093_s28, 1  ;;  %p195_p4 = scmp.ne.s32.totalorder %s1310_s25, %s1306_s24 }
   0x8   : > { %s1397_s10 = scalar_select %p25_p1, %s1314_s26, %s27_s8  }
   0x9   : > { %p36_p5 = por %p35_p2, %p34_p0  ;;  %p1399_p6 = por %p190_p3, %p34_p0 }
   0xa   : > { %p196_p7 = scmp.eq.s32.totalorder %s1094_s29, 1  ;;  %p1096_p9 = scmp.ge.s32.totalorder %s1318_s27, 2 }
   0xc   : > { %p1403_p8 = por %p196_p7, %p195_p4  ;;  %230 = sbr.rel (%p1096_p9) target bundleno = 27 (0x1b), region = 40 }
  0x11   : > { %233 = sbr.rel (!%p36_p5) target bundleno = 27 (0x1b), region = 44  ;;  %s235_s13 = sand.u32 (%p36_p5), 1, %s1314_s26  }
  0x12   : > { %s1187_s14 = sshll.u32 (%p36_p5), %s1318_s27, 3  ;;  %s1203_s15 = smul.u32 (%p36_p5), 48, %s235_s13 }
  0x13   : > { %s240_s18 = scalar_lea.vmem (%p36_p5), %s1718_s0, %s1187_s14 }
  0x14   : > { %v279_v0 = vld [vmem:[%s240_s18] sm:$0xff] (%p36_p5)  ;;  %v281_v1 = vld [vmem:[%s240_s18 + $0x10] sm:$0xff] (%p36_p5)  ;;  %s237_s19 = scalar_lea.vmem (%p36_p5), [#allocation2], %s1203_s15 }
  0x15   : > { %v283_v2 = vld [vmem:[%s240_s18 + $0x20] sm:$0xff] (%p36_p5)  ;;  %280 = vst [vmem:[%s237_s19] sm:$0xff] (%p36_p5), %v279_v0  ;;  %v285_v3 = vld [vmem:[%s240_s18 + $0x30] sm:$0xff] (%p36_p5) }
  0x16   : > { %282 = vst [vmem:[%s237_s19 + $0x8] sm:$0xff] %v281_v1  ;;  %v287_v4 = vld [vmem:[%s240_s18 + $0x40] sm:$0xff]  ;;  %v289_v5 = vld [vmem:[%s240_s18 + $0x50] sm:$0xff] }
  0x17   : > { %284 = vst [vmem:[%s237_s19 + $0x10] sm:$0xff] %v283_v2 }
  0x18   : > { %286 = vst [vmem:[%s237_s19 + $0x18] sm:$0xff] %v285_v3 }
  0x19   : > { %288 = vst [vmem:[%s237_s19 + $0x20] sm:$0xff] %v287_v4 }
  0x1a   : > { %290 = vst [vmem:[%s237_s19 + $0x28] sm:$0xff] %v289_v5 }
  0x1b PF: > { %p1099_p10 = scmp.ge.s32.totalorder %s1318_s27, 1  ;;  %p295_p11 = scmp.lt.s32.totalorder %s1318_s27, 3 }
  0x1d   : > { %p296_p12 = pnand %p1099_p10, %p295_p11 }
  0x1e   : > { %s1424_s29 = sand.u32 (!%p296_p12), 1, %s1310_s25   ;;  %s1276_s19 = scalar_lea.hbm (!%p296_p12), %s1725_s7, 4 }
  0x1f   : > { %299 = sbr.rel (%p296_p12) target bundleno = 761 (0x2f9), region = 82  ;;  %s1100_s20 = sshll.u32 (!%p296_p12), %s1424_s29, 1 }
  0x20   : > { %s1204_s8 = smul.u32 (!%p296_p12), 48, %s1424_s29  ;;  %s1014_s14 = scalar_lea.sflag (!%p296_p12), [#allocation4], %s1424_s29 }
  0x22   : > { %s1427_s9 = scalar_lea.vmem (!%p296_p12), [#allocation2], %s1204_s8 }
  0x24   : > { %v364_v6 = vld [vmem:[%s1724_s6 + $0x20] sm:$0xff]  ;;  %v362_v7 = vld [vmem:[%s1724_s6 + $0x10] sm:$0xff]  ;;  %v1320_v8 = vmov 0   ;;  %v1193_v10 = vld [vmem:[%s1427_s9 + $0x24] sm:$0xf0]  ;;  %vm441_vm0 = vcmask 392192  }
  0x25   : > { %1246 = vset.pattern.permute.xlu1 %v1320_v8  ;;  %1245 = vset.pattern.permute.xlu0 %v1320_v8  ;;  %v1131_v9 = vld [vmem:[%s1427_s9 + $0x20] sm:$0xf]  ;;  %v1192_v11 = vld [vmem:[%s1427_s9 + $0x24] sm:$0xf]  ;;  %v1133_v13 = vld [vmem:[%s1427_s9 + $0x28] sm:$0xf0] }
  0x26   : > { %388 = vperm.xlu0 %1245, %v364_v6   ;;  %378 = vperm.xlu1 %1246, %v362_v7   ;;  %v1132_v12 = vor.u32 %v1193_v10, %v1131_v9  ;;  %v1123_v14 = vld [vmem:[%s1427_s9 + $0x10] sm:$0xf]  ;;  %v1191_v15 = vld [vmem:[%s1427_s9 + $0x14] sm:$0xf0]  ;;  %v1136_v16 = vor.u32 %v1192_v11, %v1133_v13  ;;  %v1190_v17 = vld [vmem:[%s1427_s9 + $0x14] sm:$0xf] }
  0x27   : > { %1247 = vset.pattern.permute.xlu2 %v1320_v8  ;;  %v1125_v18 = vld [vmem:[%s1427_s9 + $0x18] sm:$0xf0]  ;;  %v1124_v21 = vor.u32 %v1191_v15, %v1123_v14  ;;  %v1115_v23 = vld [vmem:[%s1427_s9] sm:$0xf]  ;;  %v1189_v24 = vld [vmem:[%s1427_s9 + $0x4] sm:$0xf0] }
  0x28   : > { %456 = vmatpush.bf16.msra.mxu0 %v1132_v12  ;;  %v365_v19 = vld [vmem:[%s1724_s6 + $0x28] sm:$0xff]  ;;  %v363_v20 = vld [vmem:[%s1724_s6 + $0x18] sm:$0xff]  ;;  %480 = vmatpush.bf16.msra.mxu1 %v1136_v16  ;;  %v1128_v22 = vor.u32 %v1190_v17, %v1125_v18  ;;  %v360_v25 = vld [vmem:[%s1724_s6] sm:$0xff]  ;;  %v1116_v28 = vor.u32 %v1189_v24, %v1115_v23  ;;  %vm742_vm1 = vcmask 130048   ;;  %vm1005_vm9 = vcmask 1040384  }
  0x29   : > { %v1188_v26 = vld [vmem:[%s1427_s9 + $0x4] sm:$0xf]  ;;  %v1117_v27 = vld [vmem:[%s1427_s9 + $0x8] sm:$0xf0]  ;;  %368 = vperm.xlu2 %1247, %v360_v25   ;;  %v339_v6 = vld [vmem:[%s1427_s9 + $0x18] sm:$0xff] }
  0x2a   : > { %v1120_v29 = vor.u32 %v1188_v26, %v1117_v27  ;;  %v361_v30 = vld [vmem:[%s1724_s6 + $0x8] sm:$0xff]  ;;  %v669_v31 = vld [vmem:[%s1724_s6 + $0x60] sm:$0xff]  ;;  %v725_v34 = vld [vmem:[%s1724_s6 + $0x70] sm:$0xff]  ;;  %v1548_v17 = vunpack.c.h.bf16 %v339_v6 }
  0x2b   : > { %v670_v32 = vld [vmem:[%s1724_s6 + $0x68] sm:$0xff]  ;;  %v1194_v33 = vld [vmem:[%s1719_s1] sm:$0xff]  ;;  %v726_v35 = vld [vmem:[%s1724_s6 + $0x78] sm:$0xff] }
  0x2c   : > { %457 = vmatpush.bf16.msra.mxu0 %v1124_v21  ;;  %481 = vmatpush.bf16.msra.mxu1 %v1128_v22  ;;  %v782_v36 = vld [vmem:[%s1724_s6 + $0x80] sm:$0xff]  ;;  %v783_v37 = vld [vmem:[%s1724_s6 + $0x88] sm:$0xff]  ;;  %v535_v38 = vld [vmem:[%s1724_s6 + $0x30] sm:$0xff] }
  0x2d   : > { %v536_v39 = vld [vmem:[%s1724_s6 + $0x38] sm:$0xff]  ;;  %v1195_v40 = vld [vmem:[%s1719_s1 + $0x8] sm:$0xff]  ;;  %v537_v41 = vld [vmem:[%s1724_s6 + $0x40] sm:$0xff] }
  0x2e   : > { %393 = vperm.xlu0 %1245, %v365_v19   ;;  %383 = vperm.xlu1 %1246, %v363_v20   ;;  %v538_v42 = vld [vmem:[%s1724_s6 + $0x48] sm:$0xff]  ;;  %v539_v43 = vld [vmem:[%s1724_s6 + $0x50] sm:$0xff]  ;;  %v872_v44 = vld [vmem:[%s1724_s6 + $0x98] sm:$0xff] }
  0x2f   : > { %v873_v45 = vld [vmem:[%s1724_s6 + $0xa0] sm:$0xff]  ;;  %v540_v46 = vld [vmem:[%s1724_s6 + $0x58] sm:$0xff]  ;;  %v1196_v47 = vld [vmem:[%s1719_s1 + $0x10] sm:$0xff] }
  0x30   : > { %458 = vmatpush.bf16.msra.mxu0 %v1116_v28  ;;  %482 = vmatpush.bf16.msra.mxu1 %v1120_v29  ;;  %v874_v48 = vld [vmem:[%s1724_s6 + $0xa8] sm:$0xff]  ;;  %v875_v49 = vld [vmem:[%s1724_s6 + $0xb0] sm:$0xff]  ;;  %v876_v50 = vld [vmem:[%s1724_s6 + $0xb8] sm:$0xff] }
  0x31   : > { %373 = vperm.xlu2 %1247, %v361_v30   ;;  %v837_v51 = vld [vmem:[%s1724_s6 + $0x90] sm:$0xff]  ;;  %v877_v52 = vld [vmem:[%s1724_s6 + $0xc0] sm:$0xff]  ;;  %v878_v53 = vld [vmem:[%s1724_s6 + $0xc8] sm:$0xff] }
  0x32   : > { %v1200_v54 = vld [vmem:[%s1720_s2] sm:$0xff]  ;;  %v341_v7 = vld [vmem:[%s1427_s9 + $0x28] sm:$0xff] }
  0x33   : > { %1137 = vmatmul.msk.bf16.vlgmr.msra.gmra.mxu0 %vm441_vm0, %v1194_v33  ;;  %1140 = vmatmul.msk.bf16.vlgmr.msra.gmra.mxu1 %vm441_vm0, %v1194_v33  ;;  %v340_v4 = vld [vmem:[%s1427_s9 + $0x20] sm:$0xff]  ;;  %v338_v8 = vld [vmem:[%s1427_s9 + $0x10] sm:$0xff]  ;;  %v337_v19 = vld [vmem:[%s1427_s9 + $0x8] sm:$0xff]  ;;  %v1553_v23 = vunpack.c.h.bf16 %v341_v7 }
  0x34   : > { %694 = vmatpush.bf16.msrb.mxu0 %v1132_v12  ;;  %708 = vmatpush.bf16.msrb.mxu1 %v1136_v16  ;;  %v336_v5 = vld [vmem:[%s1427_s9] sm:$0xff]  ;;  %v1538_v9 = vunpack.c.l.bf16 %v340_v4  ;;  %v1540_v11 = vunpack.c.h.bf16 %v340_v4  ;;  %v1546_v16 = vunpack.c.l.bf16 %v339_v6  ;;  %v1555_v24 = vunpack.c.l.bf16 %v338_v8  ;;  %s1184_s9 = sshll.u32 %s1093_s28, 1  ;;  %s332_s28 = scalar_lea.vmem [#allocation3], %s1100_s20 }
  0x35   : > { %v1542_v14 = vunpack.c.l.bf16 %v336_v5  ;;  %v1544_v15 = vunpack.c.h.bf16 %v336_v5  ;;  %v1557_v26 = vunpack.c.h.bf16 %v338_v8  ;;  %s1024_s23 = scalar_lea.hbm %s1725_s7, %s1184_s9  ;;  %s1026_s8 = sshll.u32 %s332_s28, 4  ;;  %s1027_s8 = int_to_ptr.vmem [resolvable:$true] %s1026_s8 }
  0x36   : > { %673 = vperm.xlu0 %1245, %v669_v31   ;;  %678 = vperm.xlu1 %1246, %v670_v32   ;;  %s1028_s13 = sshll.u32 %s1024_s23, 4  ;;  %s1029_s13 = int_to_ptr.hbm [resolvable:$true] %s1028_s13 }
  0x37   : > { %s1270_s15 = sshra.s32 %s1029_s13, 4  ;;  %s1271_s15 = int_to_ptr.hbm [resolvable:$true] %s1270_s15 }
  0x38   : > { %695 = vmatpush.bf16.msrb.mxu0 %v1124_v21  ;;  %709 = vmatpush.bf16.msrb.mxu1 %v1128_v22  ;;  %v1551_v22 = vunpack.c.l.bf16 %v341_v7  ;;  %s1272_s16 = scalar_lea.hbm %s1271_s15, 2  ;;  %p1277_p2 = scmp.lt.s32.totalorder %s1271_s15, %s1725_s7 }
  0x39   : > { %729 = vperm.xlu2 %1247, %v725_v34   ;;  %p1273_p13 = scmp.ne.s32.totalorder %s1271_s15, %s1272_s16  ;;  %p1278_p3 = scmp.lt.s32.totalorder %s1276_s19, %s1272_s16 }
  0x3b   : > { %p1274_p0 = pnand %p1273_p13, %p1399_p6  ;;  %p1279_p4 = por %p1278_p3, %p1277_p2 }
  0x3c   : > { %696 = vmatpush.bf16.msrb.mxu0 %v1116_v28  ;;  %710 = vmatpush.bf16.msrb.mxu1 %v1120_v29 }
  0x3d   : > { %p1275_p1 = pneg %p1274_p0 }
  0x3e   : > { %734 = vperm.xlu0 %1245, %v726_v35   ;;  %786 = vperm.xlu1 %1246, %v782_v36   ;;  %v1561_v35 = vunpack.c.l.bf16 %v337_v19 }
  0x3f   : > { %p1280_p5 = pnand %p1279_p4, %p1275_p1 }
  0x41   : > { %791 = vperm.xlu2 %1247, %v783_v37   ;;  %v1563_v37 = vunpack.c.h.bf16 %v337_v19  ;;  %v1197_v19 = vld [vmem:[%s1719_s1 + $0x18] sm:$0xff] }
  0x43   : > { %1138 = vmatmul.msk.bf16.gmra.mxu0 %vm441_vm0, %v1195_v40  ;;  %1141 = vmatmul.msk.bf16.gmra.mxu1 %vm441_vm0, %v1195_v40 }
  0x46   : > { %543 = vperm.xlu0 %1245, %v535_v38   ;;  %548 = vperm.xlu1 %1246, %v536_v39  }
  0x49   : > { %553 = vperm.xlu2 %1247, %v537_v41  }
  0x4e   : > { %558 = vperm.xlu0 %1245, %v538_v42   ;;  %563 = vperm.xlu1 %1246, %v539_v43  }
  0x51   : > { %881 = vperm.xlu2 %1247, %v872_v44  }
  0x53   : > { %1139 = vmatmul.msk.bf16.gmra.mxu0 %vm441_vm0, %v1196_v47  ;;  %1142 = vmatmul.msk.bf16.gmra.mxu1 %vm441_vm0, %v1196_v47 }
  0x56   : > { %886 = vperm.xlu0 %1245, %v873_v45   ;;  %568 = vperm.xlu1 %1246, %v540_v46  }
  0x59   : > { %891 = vperm.xlu2 %1247, %v874_v48  }
  0x5e   : > { %896 = vperm.xlu0 %1245, %v875_v49   ;;  %901 = vperm.xlu1 %1246, %v876_v50  }
  0x61   : > { %840 = vperm.xlu2 %1247, %v837_v51  }
  0x63   : > { %1165 = vmatmul.msk.bf16.vlgmr.msrb.gmra.mxu0 %vm441_vm0, %v1200_v54  ;;  %1166 = vmatmul.msk.bf16.vlgmr.msrb.gmra.mxu1 %vm441_vm0, %v1200_v54 }
  0x66   : > { %906 = vperm.xlu0 %1245, %v877_v52   ;;  %945 = vperm.xlu1 %1246, %v878_v53  }
  0x83   : > { %v369_v1 = vpop.permute.xlu2 %368 }
  0x8b   : > { %v374_v30 = vpop.permute.xlu2 %373 }
  0x98   : > { %v379_v63 = vpop.permute.xlu1 %378  ;;  %v389_v0 = vpop.permute.xlu0 %388 }
  0xa0   : > { %v384_v13 = vpop.permute.xlu1 %383  ;;  %v394_v18 = vpop.permute.xlu0 %393 }
  0xa8   : > { %v674_v5 = vpop.permute.xlu0 %673  ;;  %v679_v6 = vpop.permute.xlu1 %678 }
  0xb0   : > { %v460_v55 = vpop.f32.mrf.mxu0  ;;  %v484_v56 = vpop.f32.mrf.mxu1 }
  0xb1   : > { %v461_v43 = vadd.f32 %v460_v55, %v369_v1  ;;  %v485_v44 = vadd.f32 %v484_v56, %v369_v1 }
  0xb8   : > { %v462_v57 = vpop.f32.mrf.mxu0  ;;  %v486_v58 = vpop.f32.mrf.mxu1 }
  0xb9   : > { %v463_v36 = vadd.f32 %v462_v57, %v374_v30  ;;  %v487_v38 = vadd.f32 %v486_v58, %v374_v30  ;;  %v499_v57 = vmul.f32 %v461_v43, %v1542_v14 }
  0xbb   : > { %v501_v51 = vmul.f32 %v463_v36, %v1561_v35  ;;  %v502_v52 = vmul.f32 %v487_v38, %v1563_v37  ;;  %v1631_v36 = vpop.permute.xlu2 %729  ;;  %v1633_v38 = vpop.permute.xlu0 %734 }
  0xbd   : > { %v513_v1 = vadd.f32 %v501_v51, %v1561_v35 }
  0xc0   : > { %v465_v59 = vpop.f32.mrf.mxu0  ;;  %v489_v60 = vpop.f32.mrf.mxu1 }
  0xc1   : > { %v466_v25 = vadd.f32 %v465_v59, %v379_v63  ;;  %v490_v27 = vadd.f32 %v489_v60, %v379_v63  ;;  %v500_v60 = vmul.f32 %v485_v44, %v1544_v15 }
  0xc3   : > { %v503_v45 = vmul.f32 %v466_v25, %v1555_v24  ;;  %v504_v46 = vmul.f32 %v490_v27, %v1557_v26  ;;  %v512_v4 = vadd.f32 %v500_v60, %v1544_v15 }
  0xc8   : > { %v467_v61 = vpop.f32.mrf.mxu0  ;;  %v491_v62 = vpop.f32.mrf.mxu1 }
  0xc9   : > { %v468_v20 = vadd.f32 %v467_v61, %v384_v13  ;;  %v492_v21 = vadd.f32 %v491_v62, %v384_v13  ;;  %v1598_v61 = vadd.f32 %v503_v45, %v1555_v24  ;;  %v1601_v62 = vadd.f32 %v504_v46, %v1557_v26 }
  0xcb   : > { %v505_v39 = vmul.f32 %v468_v20, %v1546_v16  ;;  %v506_v40 = vmul.f32 %v492_v21, %v1548_v17 }
  0xcd   : > { %v1590_v55 = vadd.f32 %v505_v39, %v1546_v16  ;;  %v1593_v56 = vadd.f32 %v506_v40, %v1548_v17  ;;  %v1635_v39 = vpop.permute.xlu2 %791  ;;  %v544_v40 = vpop.permute.xlu0 %543 }
  0xcf   : > { %v525_v63 = vpack.c.bf16 %v1590_v55, %v1598_v61 }
  0xd0   : > { %v470_v2 = vpop.f32.mrf.mxu0  ;;  %v494_v3 = vpop.f32.mrf.mxu1 }
  0xd1   : > { %v471_v10 = vadd.f32 %v470_v2, %v389_v0  ;;  %v495_v12 = vadd.f32 %v494_v3, %v389_v0  ;;  %v526_v0 = vpack.c.bf16 %v1593_v56, %v1601_v62  ;;  %v514_v2 = vadd.f32 %v502_v52, %v1563_v37 }
  0xd2   : > { %v511_v3 = vadd.f32 %v499_v57, %v1542_v14 }
  0xd3   : > { %v507_v31 = vmul.f32 %v471_v10, %v1538_v9  ;;  %v508_v32 = vmul.f32 %v495_v12, %v1540_v11  ;;  %v524_v12 = vpack.c.bf16 %v514_v2, %v512_v4 }
  0xd4   : > { %v523_v10 = vpack.c.bf16 %v513_v1, %v511_v3 }
  0xd5   : > { %v1572_v47 = vadd.f32 %v507_v31, %v1538_v9  ;;  %v1578_v49 = vadd.f32 %v508_v32, %v1540_v11  ;;  %v1198_v32 = vld [vmem:[%s1719_s1 + $0x20] sm:$0xff]  ;;  %v554_v44 = vpop.permute.xlu2 %553  ;;  %v559_v51 = vpop.permute.xlu0 %558 }
  0xd8   : > { %v472_v28 = vpop.f32.mrf.mxu0  ;;  %v496_v29 = vpop.f32.mrf.mxu1 }
  0xd9   : > { %v473_v33 = vadd.f32 %v472_v28, %v394_v18  ;;  %v497_v34 = vadd.f32 %v496_v29, %v394_v18 }
  0xdb   : > { %v509_v41 = vmul.f32 %v473_v33, %v1551_v22  ;;  %v510_v42 = vmul.f32 %v497_v34, %v1553_v23  ;;  %v1199_v33 = vld [vmem:[%s1719_s1 + $0x28] sm:$0xff]  ;;  %v1201_v34 = vld [vmem:[%s1721_s3] sm:$0xff] }
  0xdd   : > { %v1575_v48 = vadd.f32 %v509_v41, %v1551_v22  ;;  %v1581_v50 = vadd.f32 %v510_v42, %v1553_v23  ;;  %v1637_v41 = vpop.permute.xlu1 %786 }
  0xdf   : > { %v527_v53 = vpack.c.bf16 %v1575_v48, %v1572_v47  ;;  %v528_v54 = vpack.c.bf16 %v1581_v50, %v1578_v49 }
  0xe0   : > { %v698_v58 = vpop.f32.mrf.mxu0  ;;  %v712_v59 = vpop.f32.mrf.mxu1 }
  0xe1   : > { %600 = vmatpush.bf16.msra.mxu2 %v527_v53  ;;  %624 = vmatpush.bf16.msra.mxu3 %v528_v54  ;;  %v699_v7 = vadd.f32 %v698_v58, %v674_v5  ;;  %v713_v8 = vadd.f32 %v712_v59, %v674_v5 }
  0xe3   : > { %v717_v25 = vmax.f32 %v699_v7, 0.0  ;;  %v718_v27 = vmax.f32 %v713_v8, 0.0  ;;  %v882_v7 = vpop.permute.xlu2 %881 }
  0xe5   : > { %601 = vmatpush.bf16.msra.mxu2 %v525_v63  ;;  %625 = vmatpush.bf16.msra.mxu3 %v526_v0  ;;  %v549_v52 = vpop.permute.xlu1 %548 }
  0xe8   : > { %v700_v13 = vpop.f32.mrf.mxu0  ;;  %v714_v18 = vpop.f32.mrf.mxu1 }
  0xe9   : > { %v701_v20 = vadd.f32 %v700_v13, %v679_v6  ;;  %v715_v21 = vadd.f32 %v714_v18, %v679_v6  ;;  %602 = vmatpush.bf16.msra.mxu2 %v523_v10  ;;  %626 = vmatpush.bf16.msra.mxu3 %v524_v12  ;;  %v887_v12 = vpop.permute.xlu0 %886 }
  0xeb   : > { %v719_v28 = vmax.f32 %v701_v20, 0.0  ;;  %v720_v29 = vmax.f32 %v715_v21, 0.0 }
  0xec   : > { %1155 = vmatmul.msk.bf16.vlgmr.msra.gmra.mxu2 %vm441_vm0, %v1197_v19  ;;  %1158 = vmatmul.msk.bf16.vlgmr.msra.gmra.mxu3 %vm441_vm0, %v1197_v19 }
  0xed   : > { %v723_v30 = vpack.c.bf16 %v719_v28, %v717_v25  ;;  %v724_v31 = vpack.c.bf16 %v720_v29, %v718_v27 }
  0xef   : > { %753 = vmatpush.bf16.msrb.mxu2 %v723_v30  ;;  %767 = vmatpush.bf16.msrb.mxu3 %v724_v31 }
  0xfc   : > { %1156 = vmatmul.msk.bf16.gmra.mxu2 %vm441_vm0, %v1198_v32  ;;  %1159 = vmatmul.msk.bf16.gmra.mxu3 %vm441_vm0, %v1198_v32 }
 0x10c   : > { %1157 = vmatmul.msk.bf16.gmra.mxu2 %vm441_vm0, %v1199_v33  ;;  %1160 = vmatmul.msk.bf16.gmra.mxu3 %vm441_vm0, %v1199_v33 }
 0x11c   : > { %1171 = vmatmul.msk.bf16.vlgmr.msrb.gmra.mxu2 %vm742_vm1, %v1201_v34  ;;  %1172 = vmatmul.msk.bf16.vlgmr.msrb.gmra.mxu3 %vm742_vm1, %v1201_v34 }
 0x16f   : > { %v604_v42 = vpop.f32.mrf.mxu2  ;;  %v628_v43 = vpop.f32.mrf.mxu3 }
 0x170   : > { %v605_v45 = vadd.f32 %v604_v42, %v544_v40  ;;  %v629_v46 = vadd.f32 %v628_v43, %v544_v40 }
 0x172   : > { %v643_v53 = vmul.f32 %v605_v45, %v1542_v14  ;;  %v644_v54 = vmul.f32 %v629_v46, %v1544_v15  ;;  %v897_v45 = vpop.permute.xlu0 %896 }
 0x174   : > { %v655_v63 = vadd.f32 %v643_v53, %v511_v3  ;;  %v656_v0 = vadd.f32 %v644_v54, %v512_v4  ;;  %v564_v3 = vpop.permute.xlu1 %563 }
 0x176   : > { %v909_v13 = vmul.f32 %v882_v7, %v655_v63  ;;  %v910_v18 = vmul.f32 %v882_v7, %v656_v0 }
 0x177   : > { %v606_v57 = vpop.f32.mrf.mxu2  ;;  %v630_v58 = vpop.f32.mrf.mxu3 }
 0x178   : > { %v607_v59 = vadd.f32 %v606_v57, %v549_v52  ;;  %v631_v60 = vadd.f32 %v630_v58, %v549_v52 }
 0x17a   : > { %v645_v5 = vmul.f32 %v607_v59, %v1561_v35  ;;  %v646_v6 = vmul.f32 %v631_v60, %v1563_v37 }
 0x17c   : > { %v657_v8 = vadd.f32 %v645_v5, %v513_v1  ;;  %v658_v10 = vadd.f32 %v646_v6, %v514_v2  ;;  %v892_v2 = vpop.permute.xlu2 %891 }
 0x17e   : > { %v911_v19 = vmul.f32 %v887_v12, %v657_v8  ;;  %v912_v14 = vmul.f32 %v887_v12, %v658_v10 }
 0x17f   : > { %v609_v20 = vpop.f32.mrf.mxu2  ;;  %v633_v15 = vpop.f32.mrf.mxu3 }
 0x180   : > { %v921_v21 = vadd.f32 %v911_v19, %v909_v13  ;;  %v932_v25 = vadd.f32 %v912_v14, %v910_v18  ;;  %v610_v27 = vadd.f32 %v609_v20, %v554_v44  ;;  %v634_v28 = vadd.f32 %v633_v15, %v554_v44 }
 0x182   : > { %v647_v4 = vmul.f32 %v610_v27, %v1555_v24  ;;  %v648_v35 = vmul.f32 %v634_v28, %v1557_v26  ;;  %v569_v24 = vpop.permute.xlu1 %568 }
 0x184   : > { %v659_v37 = vadd.f32 %v647_v4, %v1598_v61  ;;  %v660_v1 = vadd.f32 %v648_v35, %v1601_v62 }
 0x186   : > { %v913_v29 = vmul.f32 %v892_v2, %v659_v37  ;;  %v914_v30 = vmul.f32 %v892_v2, %v660_v1  ;;  %v1202_v1 = vld [vmem:[%s1722_s4] sm:$0xff] }
 0x187   : > { %v611_v31 = vpop.f32.mrf.mxu2  ;;  %v635_v32 = vpop.f32.mrf.mxu3 }
 0x188   : > { %v922_v33 = vadd.f32 %v921_v21, %v913_v29  ;;  %v933_v34 = vadd.f32 %v932_v25, %v914_v30  ;;  %v612_v40 = vadd.f32 %v611_v31, %v559_v51  ;;  %v636_v42 = vadd.f32 %v635_v32, %v559_v51 }
 0x18a   : > { %v649_v43 = vmul.f32 %v612_v40, %v1546_v16  ;;  %v650_v44 = vmul.f32 %v636_v42, %v1548_v17 }
 0x18c   : > { %v661_v26 = vadd.f32 %v649_v43, %v1590_v55  ;;  %v662_v61 = vadd.f32 %v650_v44, %v1593_v56  ;;  %v902_v55 = vpop.permute.xlu1 %901 }
 0x18e   : > { %v915_v62 = vmul.f32 %v897_v45, %v661_v26  ;;  %v916_v46 = vmul.f32 %v897_v45, %v662_v61  ;;  %v834_v26 = vld [vmem:[%s1723_s5] sm:$0xf]  ;;  %v841_v45 = vpop.permute.xlu2 %840 }
 0x18f   : > { %v614_v52 = vpop.f32.mrf.mxu2  ;;  %v638_v53 = vpop.f32.mrf.mxu3 }
 0x190   : > { %v923_v54 = vadd.f32 %v922_v33, %v915_v62  ;;  %v934_v57 = vadd.f32 %v933_v34, %v916_v46  ;;  %v615_v58 = vadd.f32 %v614_v52, %v564_v3  ;;  %v639_v59 = vadd.f32 %v638_v53, %v564_v3 }
 0x192   : > { %v651_v51 = vmul.f32 %v615_v58, %v1538_v9  ;;  %v652_v16 = vmul.f32 %v639_v59, %v1540_v11 }
 0x194   : > { %v663_v17 = vadd.f32 %v651_v51, %v1572_v47  ;;  %v664_v60 = vadd.f32 %v652_v16, %v1578_v49  ;;  %v907_v47 = vpop.permute.xlu0 %906 }
 0x196   : > { %v917_v63 = vmul.f32 %v902_v55, %v663_v17  ;;  %v918_v56 = vmul.f32 %v902_v55, %v664_v60 }
 0x197   : > { %v616_v0 = vpop.f32.mrf.mxu2  ;;  %v640_v5 = vpop.f32.mrf.mxu3 }
 0x198   : > { %v924_v6 = vadd.f32 %v923_v54, %v917_v63  ;;  %v935_v7 = vadd.f32 %v934_v57, %v918_v56  ;;  %v617_v8 = vadd.f32 %v616_v0, %v569_v24  ;;  %v641_v10 = vadd.f32 %v640_v5, %v569_v24  ;;  %v946_v57 = vpop.permute.xlu1 %945 }
 0x19a   : > { %v653_v12 = vmul.f32 %v617_v8, %v1551_v22  ;;  %v654_v13 = vmul.f32 %v641_v10, %v1553_v23 }
 0x19c   : > { %v665_v9 = vadd.f32 %v653_v12, %v1575_v48  ;;  %v666_v11 = vadd.f32 %v654_v13, %v1581_v50 }
 0x19e   : > { %v919_v18 = vmul.f32 %v907_v47, %v665_v9  ;;  %v920_v49 = vmul.f32 %v907_v47, %v666_v11 }
 0x19f   : > { %v755_v19 = vpop.f32.mrf.mxu2  ;;  %v769_v14 = vpop.f32.mrf.mxu3 }
 0x1a0   : > { %v925_v20 = vadd.f32 %v924_v6, %v919_v18  ;;  %v936_v15 = vadd.f32 %v935_v7, %v920_v49  ;;  %v756_v21 = vadd.f32 %v755_v19, %v1631_v36  ;;  %v770_v25 = vadd.f32 %v769_v14, %v1631_v36 }
 0x1a2   : > { %v774_v48 = vmax.f32 %v756_v21, 0.0  ;;  %v775_v3 = vmax.f32 %v770_v25, 0.0  ;;  %v937_v61 = vrot.slane %v936_v15, 4 }
 0x1a4   : > { %v938_v62 = vadd.f32 %v937_v61, %v936_v15 }
 0x1a6   : > { %v939_v59 = vrot.slane %v938_v62, 2 }
 0x1a7   : > { %v757_v27 = vpop.f32.mrf.mxu2  ;;  %v771_v28 = vpop.f32.mrf.mxu3 }
 0x1a8   : > { %v758_v22 = vadd.f32 %v757_v27, %v1633_v38  ;;  %v772_v23 = vadd.f32 %v771_v28, %v1633_v38  ;;  %v940_v63 = vadd.f32 %v939_v59, %v938_v62 }
 0x1aa   : > { %v776_v50 = vmax.f32 %v758_v22, 0.0  ;;  %v777_v4 = vmax.f32 %v772_v23, 0.0  ;;  %v941_v13 = vrot.slane %v940_v63, 1 }
 0x1ac   : > { %v780_v35 = vpack.c.bf16 %v776_v50, %v774_v48  ;;  %v781_v37 = vpack.c.bf16 %v777_v4, %v775_v3  ;;  %v942_v19 = vadd.f32 %v941_v13, %v940_v63 }
 0x1ae   : > { %809 = vmatpush.bf16.msra.mxu0 %v780_v35  ;;  %823 = vmatpush.bf16.msra.mxu1 %v781_v37 }
 0x1b1   : > { %1177 = vmatmul.msk.bf16.vlgmr.msra.gmra.mxu0 %vm742_vm1, %v1202_v1  ;;  %1178 = vmatmul.msk.bf16.vlgmr.msra.gmra.mxu1 %vm742_vm1, %v1202_v1 }
 0x22e   : > { %v811_v36 = vpop.f32.mrf.mxu0  ;;  %v825_v2 = vpop.f32.mrf.mxu1 }
 0x22f   : > { %v812_v38 = vadd.f32 %v811_v36, %v1637_v41  ;;  %v826_v29 = vadd.f32 %v825_v2, %v1637_v41  ;;  %v926_v41 = vrot.slane %v925_v20, 4 }
 0x231   : > { %v830_v34 = vmax.f32 %v812_v38, 0.0  ;;  %v831_v40 = vmax.f32 %v826_v29, 0.0 }
 0x236   : > { %v813_v30 = vpop.f32.mrf.mxu0  ;;  %v827_v31 = vpop.f32.mrf.mxu1 }
 0x237   : > { %v814_v32 = vadd.f32 %v813_v30, %v1635_v39  ;;  %v828_v33 = vadd.f32 %v827_v31, %v1635_v39  ;;  %v927_v39 = vadd.f32 %v926_v41, %v925_v20 }
 0x239   : > { %v832_v42 = vmax.f32 %v814_v32, 0.0  ;;  %v833_v43 = vmax.f32 %v828_v33, 0.0  ;;  %v928_v58 = vrot.slane %v927_v39, 2 }
 0x23b   : > { %v835_v44 = vpack.c.bf16 %v832_v42, %v830_v34  ;;  %v836_v24 = vpack.c.bf16 %v833_v43, %v831_v40  ;;  %v929_v55 = vadd.f32 %v928_v58, %v927_v39  ;;  %v1008_v34 = vlaneseq }
 0x23d   : > { %853 = vmatpush.bf16.msra.mxu2 %v835_v44  ;;  %866 = vmatpush.bf16.msra.mxu3 %v836_v24  ;;  %v930_v10 = vrot.slane %v929_v55, 1  ;;  %vm1010_vm11 = vcmp.lt.s32.totalorder %v1008_v34, 256 }
 0x23f   : > { %v931_v18 = vadd.f32 %v930_v10, %v929_v55 }
 0x240   : > { %1179 = vmatmul.msk.bf16.vlgmr.msra.gmra.mxu2 %vm742_vm1, %v834_v26  ;;  %1180 = vmatmul.msk.bf16.vlgmr.msra.gmra.mxu3 %vm742_vm1, %v834_v26 }
 0x2c3   : > { %v855_v46 = vpop.f32.mrf.mxu2  ;;  %v868_v52 = vpop.f32.mrf.mxu3 }
 0x2c4   : > { %v856_v53 = vadd.f32 %v855_v46, %v841_v45  ;;  %v869_v54 = vadd.f32 %v868_v52, %v841_v45 }
 0x2c6   : > { %v948_v51 = vmul.f32 %v946_v57, %v856_v53  ;;  %v949_v16 = vmul.f32 %v946_v57, %v869_v54 }
 0x2c8   : > { %v950_v17 = vrot.slane %v948_v51, 4  ;;  %v956_v60 = vrot.slane %v949_v16, 4 }
 0x2ca   : > { %v951_v56 = vadd.f32 %v950_v17, %v948_v51  ;;  %v957_v0 = vadd.f32 %v956_v60, %v949_v16 }
 0x2cb   : > { %v870_v5 = vpop.f32.mrf.mxu3  ;;  %v857_v6 = vpop.f32.mrf.mxu2 }
 0x2cc   : > { %v952_v7 = vrot.slane %v951_v56, 2  ;;  %v958_v8 = vrot.slane %v957_v0, 2 }
 0x2ce   : > { %v953_v12 = vadd.f32 %v952_v7, %v951_v56  ;;  %v959_v9 = vadd.f32 %v958_v8, %v957_v0 }
 0x2d0   : > { %v954_v11 = vrot.slane %v953_v12, 1  ;;  %v960_v47 = vrot.slane %v959_v9, 1 }
 0x2d2   : > { %v955_v49 = vadd.f32 %v954_v11, %v953_v12  ;;  %v961_v14 = vadd.f32 %v960_v47, %v959_v9 }
 0x2d4   : > { %v962_v20 = vadd.f32 %v955_v49, %v931_v18  ;;  %v963_v15 = vadd.f32 %v961_v14, %v942_v19 }
 0x2d6   : > { %v1181_v21 = vmul.f32 -1.442695, %v962_v20  ;;  %v1182_v25 = vmul.f32 -1.442695, %v963_v15 }
 0x2d8   : > { %1248 = vpow2.f32 %v1181_v21 }
 0x2d9   : > { %1250 = vpow2.f32 %v1182_v25 }
 0x2de   : > { %v1249_v27 = vpop.eup %1248 }
 0x2df   : > { %v1251_v28 = vpop.eup %1250  ;;  %v970_v22 = vadd.f32 1.0, %v1249_v27 }
 0x2e0   : > { %v971_v23 = vadd.f32 1.0, %v1251_v28 }
 0x2e1   : > { %1252 = vrcp.f32 %v970_v22  ;;  %vm977_vm4 = vweird.f32 %v970_v22  ;;  %v983_v30 = vand.u32 2147483648, %v970_v22  ;;  %v981_v32 = vand.u32 2147483647, %v970_v22 }
 0x2e2   : > { %1254 = vrcp.f32 %v971_v23  ;;  %v998_v36 = vand.u32 2147483648, %v971_v23  ;;  %v996_v38 = vand.u32 2147483647, %v971_v23  ;;  %vm992_vm6 = vweird.f32 %v971_v23 }
 0x2e3   : > { %v984_v44 = vor.u32 1.1754944e-38, %v983_v30  ;;  %vm982_vm10 = vcmp.eq.f32.partialorder %v981_v32, 8.507059e+37 }
 0x2e4   : > { %v999_v40 = vor.u32 1.1754944e-38, %v998_v36  ;;  %vm997_vm8 = vcmp.eq.f32.partialorder %v996_v38, 8.507059e+37 }
 0x2e7   : > { %v1253_v48 = vpop.eup %1252 }
 0x2e8   : > { %v1255_v3 = vpop.eup %1254  ;;  %v973_v50 = vmul.f32 %v1253_v48, %v970_v22  ;;  %vm978_vm2 = vweird.f32 %v1253_v48 }
 0x2e9   : > { %v988_v4 = vmul.f32 %v1255_v3, %v971_v23  ;;  %vm993_vm3 = vweird.f32 %v1255_v3  ;;  %vm1683_vm5 = vmor %vm977_vm4, %vm978_vm2 }
 0x2ea   : > { %v974_v35 = vsub.f32 1.0, %v973_v50  ;;  %vm994_vm7 = vmor %vm992_vm6, %vm993_vm3 }
 0x2eb   : > { %v989_v37 = vsub.f32 1.0, %v988_v4 }
 0x2ec   : > { %v975_v1 = vmul.f32 %v1253_v48, %v974_v35 }
 0x2ed   : > { %v990_v2 = vmul.f32 %v1255_v3, %v989_v37 }
 0x2ee   : > { %v976_v29 = vadd.f32 %v1253_v48, %v975_v1 }
 0x2ef   : > { %v991_v33 = vadd.f32 %v1255_v3, %v990_v2 }
 0x2f0   : > { %v980_v42 = vsel %vm1683_vm5, %v1253_v48, %v976_v29 }
 0x2f1   : > { %v995_v43 = vsel %vm994_vm7, %v1255_v3, %v991_v33  ;;  %v985_v41 = vsel %vm982_vm10, %v984_v44, %v980_v42 }
 0x2f2   : > { %v1000_v24 = vsel %vm997_vm8, %v999_v40, %v995_v43 }
 0x2f3   : > { %v1004_v26 = vrot.slane %v1000_v24, 7 }
 0x2f5   : > { %v1006_v61 = vsel %vm1005_vm9, %v985_v41, %v1004_v26 }
 0x2f6   : > { %1012 = vst.msk [vmem:[%s332_s28] sm:$0x3] %vm1010_vm11, %v1006_v61 }
 0x2f7   : > { %1283 = shalt.err (!%p1280_p5)
}
 0x2f8   : > { %1205 = dma.vmem_to_hbm [thread:$0]  (%p1399_p6), %s1027_s8, 32, %s1029_s13, %s1014_s14  }
 0x2f9 PF: > { %s1040_s29 = sand.u32 1, %s1306_s24   ;;  %p1208_p7 = pnand %p1096_p9, %p1403_p8 }
 0x2fa   : > { %s1041_s21 = scalar_lea.sflag [#allocation4], %s1040_s29 }
 0x2fb   : > { %p1209_p10 = pneg %p1208_p7 }
 0x2fd   : > { %1301 = dma.done.wait (%p1209_p10), %s1041_s21, 32  }
 0x2fe   : > { %1303 = vsyncadd (%p1209_p10), %s1041_s21, 4294967264  ;;  %p17_p11 = scmp.ge.s32.totalorder %s1384_s30, 4   ;;  %s1730_s24 = smov %s1310_s25 }
 0x2ff   : > { %s1731_s25 = smov %s1314_s26  ;;  %s1732_s26 = smov %s1397_s10 }
 0x300   : > { %s1733_s27 = smov %s1384_s30  ;;  %19 = sbr.rel (!%p17_p11) target bundleno = 3 (0x3), region = 126 }
 0x305   :  { %1047 = vsyncpa [#allocation4], 1 }
 0x306   :  { %1049 = vsyncpa [#allocation4 + $0x1], 1 }

</bundles_post_ra>
